<compile_context>
chip_gen: v7x
topology: tpu7x:2x2x1
jax: 0.10.0
libtpu: 0.0.40
codegen_flags: <defaults>
</compile_context>

<pallas_src>
import functools

import jax
import jax.numpy as jnp
from jax import lax
from jax.experimental import pallas as pl
from jax.experimental.pallas import tpu as pltpu

# Contract dim 1 of LHS with dim 1 of RHS (i.e. x @ W.T without materializing a transpose).
_TRANS_B = (((1,), (1,)), ((), ()))


def _ae_kernel(x_ref, w1_ref, b1_ref, w2_ref, b2_ref, o_ref):
    # x_ref:  (M, D_in)      f32
    # w1_ref: (H, D_in)      b1_ref: (1, H)        -- PyTorch Linear layout, no transpose
    # w2_ref: (D_out, H)     b2_ref: (1, D_out)
    # o_ref:  (M, D_out)     f32
    w1 = w1_ref[...]
    w2 = w2_ref[...]
    x = x_ref[...].astype(w1.dtype)

    h = lax.dot_general(x, w1, dimension_numbers=_TRANS_B,
                        preferred_element_type=jnp.float32)
    h = jnp.maximum(h + b1_ref[...], 0.0)                     # ReLU (f32)

    y = lax.dot_general(h.astype(w2.dtype), w2, dimension_numbers=_TRANS_B,
                        preferred_element_type=jnp.float32)
    o_ref[...] = (y + b2_ref[...]).astype(o_ref.dtype)


def _run_ae(x_rows, w1, b1, w2, b2, weights_dtype):
    """x_rows: (M, D_in) f32. Weights in PyTorch layout. Returns (M, D_out) f32."""
    m = x_rows.shape[0]
    hidden_size, input_size = w1.shape
    output_size = w2.shape[0]

    w1_k = w1.astype(weights_dtype)
    w2_k = w2.astype(weights_dtype)
    b1_r = b1.reshape(1, hidden_size).astype(jnp.float32)
    b2_r = b2.reshape(1, output_size).astype(jnp.float32)

    wbytes = jnp.dtype(weights_dtype).itemsize
    cost = pl.CostEstimate(
        flops=2 * m * (input_size * hidden_size + hidden_size * output_size),
        transcendentals=0,
        bytes_accessed=(input_size * hidden_size + hidden_size * output_size) * wbytes
        + (m * input_size + hidden_size + output_size + m * output_size) * 4,
    )

    return pl.pallas_call(
        _ae_kernel,
        out_shape=jax.ShapeDtypeStruct((m, output_size), jnp.float32),
        in_specs=[
            pl.BlockSpec(memory_space=pltpu.VMEM),   # x rows       (M, D_in)
            pl.BlockSpec(memory_space=pltpu.VMEM),   # w1           (H, D_in)
            pl.BlockSpec(memory_space=pltpu.VMEM),   # b1           (1, H)
            pl.BlockSpec(memory_space=pltpu.VMEM),   # w2           (D_out, H)
            pl.BlockSpec(memory_space=pltpu.VMEM),   # b2           (1, D_out)
        ],
        out_specs=pl.BlockSpec(memory_space=pltpu.VMEM),
        cost_estimate=cost,
    )(x_rows, w1_k, b1_r, w2_k, b2_r)


@functools.partial(jax.jit, static_argnames=("weights_dtype",))
def vanilla_autoencoder(x, w1, b1, w2, b2, *, weights_dtype=jnp.float32):
    """Exact PyTorch forward: flatten everything to one vector, two Linears with ReLU.

    x : any-shaped array with input_size total elements (like torch reshape(-1))
    w1: (hidden_size, input_size)   b1: (hidden_size,)     -- PyTorch Linear layout
    w2: (output_size, hidden_size)  b2: (output_size,)
    returns: (output_size,) vector, float32
    """
    input_size = w1.shape[1]
    output_size = w2.shape[0]
    x_flat = x.reshape(1, input_size).astype(jnp.float32)
    out = _run_ae(x_flat, w1, b1, w2, b2, weights_dtype)
    return out.reshape(output_size)


@functools.partial(jax.jit, static_argnames=("weights_dtype",))
def vanilla_autoencoder_batched(x_rows, w1, b1, w2, b2, *, weights_dtype=jnp.float32):
    """Batched variant: x_rows is (B, input_size); weights loaded once for all rows."""
    return _run_ae(x_rows.astype(jnp.float32), w1, b1, w2, b2, weights_dtype)


def _init_linear(key, out_features, in_features):
    """Deterministic init matching nn.Linear's uniform(-1/sqrt(fan_in), 1/sqrt(fan_in))."""
    kw, kb = jax.random.split(key)
    bound = 1.0 / jnp.sqrt(jnp.float32(in_features))
    w = jax.random.uniform(kw, (out_features, in_features), jnp.float32, -bound, bound)
    b = jax.random.uniform(kb, (out_features,), jnp.float32, -bound, bound)
    return w, b


if __name__ == "__main__":
    # Example input: (2, 4, 16, 16) -> flattened length 2048 == input_size
    batch, channels, spatial = 2, 4, 16
    input_size = batch * channels * spatial * spatial   # 2048
    hidden_size = 128
    output_size = 256

    key = jax.random.PRNGKey(0)
    kx, k1, k2, kb = jax.random.split(key, 4)

    x = jax.random.normal(kx, (batch, channels, spatial, spatial), jnp.float32)
    w1, b1 = _init_linear(k1, hidden_size, input_size)
    w2, b2 = _init_linear(k2, output_size, hidden_size)

    # --- Per-sample path (exact PyTorch semantics) ---
    y = vanilla_autoencoder(x, w1, b1, w2, b2)
    jax.block_until_ready(y)

    x_flat = x.reshape(-1)
    h_ref = jnp.maximum(w1 @ x_flat + b1, 0.0)
    y_ref = w2 @ h_ref + b2
    assert y.shape == (output_size,)
    assert jnp.allclose(y, y_ref, atol=1e-4, rtol=1e-4)

    # --- Batched path (amortizes weight DMA + launch overhead, fills MXU sublanes) ---
    B = 8
    xb = jax.random.normal(kb, (B, input_size), jnp.float32)
    yb = vanilla_autoencoder_batched(xb, w1, b1, w2, b2)
    jax.block_until_ready(yb)
    yb_ref = jnp.maximum(xb @ w1.T + b1, 0.0) @ w2.T + b2
    assert yb.shape == (B, output_size)
    assert jnp.allclose(yb, yb_ref, atol=1e-4, rtol=1e-4)

    print("KERNEL_OK")
</pallas_src>

<mosaic_0001>
module attributes {stable_mosaic.version = 11 : i64} {
  func.func @_ae_kernel(%arg0: memref<1x2048xf32, #tpu.memory_space<vmem>>, %arg1: memref<128x2048xf32, #tpu.memory_space<vmem>>, %arg2: memref<1x128xf32, #tpu.memory_space<vmem>>, %arg3: memref<256x128xf32, #tpu.memory_space<vmem>>, %arg4: memref<1x256xf32, #tpu.memory_space<vmem>>, %arg5: memref<1x256xf32, #tpu.memory_space<vmem>>) attributes {dimension_semantics = [], scalar_prefetch = 0 : i64, scratch_operands = 0 : i64, tpu.core_type = #tpu.core_type<tc>} {
    %c0 = arith.constant 0 : index
    %c0_0 = arith.constant 0 : index
    %0 = vector.load %arg1[%c0, %c0_0] : memref<128x2048xf32, #tpu.memory_space<vmem>>, vector<128x2048xf32>
    %c0_1 = arith.constant 0 : index
    %c0_2 = arith.constant 0 : index
    %1 = vector.load %arg3[%c0_1, %c0_2] : memref<256x128xf32, #tpu.memory_space<vmem>>, vector<256x128xf32>
    %c0_3 = arith.constant 0 : index
    %c0_4 = arith.constant 0 : index
    %2 = vector.load %arg0[%c0_3, %c0_4] : memref<1x2048xf32, #tpu.memory_space<vmem>>, vector<1x2048xf32>
    %cst = arith.constant dense<0.000000e+00> : vector<1x128xf32>
    %3 = tpu.matmul %2, %0, %cst {dimension_numbers = #tpu.dot_dimension_numbers<[1], [1], [0], [0], [0, 0, 1, 0], [], []>} : vector<1x2048xf32>, vector<128x2048xf32>, vector<1x128xf32> -> vector<1x128xf32>
    %c0_5 = arith.constant 0 : index
    %c0_6 = arith.constant 0 : index
    %4 = vector.load %arg2[%c0_5, %c0_6] : memref<1x128xf32, #tpu.memory_space<vmem>>, vector<1x128xf32>
    %5 = arith.addf %3, %4 : vector<1x128xf32>
    %cst_7 = arith.constant 0.000000e+00 : f32
    %6 = vector.broadcast %cst_7 : f32 to vector<1x128xf32>
    %7 = arith.maximumf %5, %6 : vector<1x128xf32>
    %cst_8 = arith.constant dense<0.000000e+00> : vector<1x256xf32>
    %8 = tpu.matmul %7, %1, %cst_8 {dimension_numbers = #tpu.dot_dimension_numbers<[1], [1], [0], [0], [0, 0, 1, 0], [], []>} : vector<1x128xf32>, vector<256x128xf32>, vector<1x256xf32> -> vector<1x256xf32>
    %c0_9 = arith.constant 0 : index
    %c0_10 = arith.constant 0 : index
    %9 = vector.load %arg4[%c0_9, %c0_10] : memref<1x256xf32, #tpu.memory_space<vmem>>, vector<1x256xf32>
    %10 = arith.addf %8, %9 : vector<1x256xf32>
    %c0_11 = arith.constant 0 : index
    %c0_12 = arith.constant 0 : index
    %11 = vector.load %arg5[%c0_11, %c0_12] : memref<1x256xf32, #tpu.memory_space<vmem>>, vector<1x256xf32>
    tpu.vector_store %arg5[%c0_11, %c0_12], %10 {strides = array<i32>} : memref<1x256xf32, #tpu.memory_space<vmem>>, vector<1x256xf32>,
    return
  }
}

</mosaic_0001>

<bundles_post_ra>
// kernel: vanilla_autoencoder.1
= control target key start
LH: loop header
LB: loop body
LE: loop exit
PB: predicated region body
PF: predicated region fallthrough
CT: control target
= control target key end

     0   :  { %10 = vsyncpa [#allocation3], 0  ;;  %s1672_s0 = inlined_call_operand.vmem [shape: f32[1,2048], index: 0, kind: input, shape index: {}]   ;;  %s1673_s1 = inlined_call_operand.hbm [shape: f32[128,2048], index: 1, kind: input, shape index: {}]   ;;  %s1674_s2 = inlined_call_operand.vmem [shape: f32[1,128], index: 2, kind: input, shape index: {}]   ;;  %s1675_s3 = inlined_call_operand.hbm [shape: f32[256,128], index: 3, kind: input, shape index: {}]   ;;  %s1676_s4 = inlined_call_operand.vmem [shape: f32[1,256], index: 4, kind: input, shape index: {}]   ;;  %s1677_s5 = inlined_call_operand.hbm [shape: f32[1,256], index: 5, kind: output, shape index: {}]  }
   0x1   :  { %11 = vsyncpa [#allocation6], 0 }
   0x2   :  { %12 = vsyncpa [#allocation4], 0  ;;  %s1520_s18 = smov [#allocation2]   ;;  %s1448_s22 = scalar_lea.hbm %s1673_s1, 32768 }
   0x3   :  { %s20_s19 = sshll.u32 %s1520_s18, 4  ;;  %p1449_p0 = scmp.ne.s32.totalorder %s1673_s1, %s1448_s22  ;;  %s21_s19 = int_to_ptr.vmem [resolvable:$true] %s20_s19 }
   0x4   :  { %p1452_p1 = scmp.lt.u32.totalorder %s1448_s22, %s1673_s1 }
   0x6   :  { %p1454_p2 = pnand %p1452_p1, %p1449_p0 }
   0x8   :  { %1457 = shalt.err (!%p1454_p2)
}
   0x9   :  { %s1458_s27 = scalar_lea.vmem %s21_s19, 32768  ;;  %p1463_p4 = scmp.lt.s32.totalorder %s21_s19, %s21_s19 }
   0xa   :  { %p1459_p3 = scmp.ne.s32.totalorder %s21_s19, %s1458_s27  ;;  %p1464_p5 = scmp.lt.s32.totalorder %s1458_s27, %s1458_s27 }
   0xc   :  { %p1465_p6 = por %p1464_p5, %p1463_p4 }
   0xe   :  { %p1466_p7 = pnand %p1465_p6, %p1459_p3 }
  0x10   :  { %1469 = shalt.err (!%p1466_p7)
}
  0x11   :  { %s1521_s28 = smov 2048   ;;  %s1522_s29 = smov 128  }
  0x12   :  { %26 = dma.hbm_to_vmem [thread:$0]  %s1673_s1, 32768, %s21_s19, [#allocation3], %s1521_s28, %s1521_s28, %s1522_s29  }
  0x13   :  { %s1523_s7 = smov [#allocation5]   ;;  %s1470_s11 = scalar_lea.hbm %s1675_s3, 4096 }
  0x14   :  { %s34_s8 = sshll.u32 %s1523_s7, 4  ;;  %p1471_p8 = scmp.ne.s32.totalorder %s1675_s3, %s1470_s11  ;;  %s35_s8 = int_to_ptr.vmem [resolvable:$true] %s34_s8 }
  0x15   :  { %p1474_p9 = scmp.lt.u32.totalorder %s1470_s11, %s1675_s3 }
  0x17   :  { %p1476_p10 = pnand %p1474_p9, %p1471_p8 }
  0x19   :  { %1479 = shalt.err (!%p1476_p10)
}
  0x1a   :  { %s1480_s16 = scalar_lea.vmem %s35_s8, 4096  ;;  %p1485_p12 = scmp.lt.s32.totalorder %s35_s8, %s35_s8 }
  0x1b   :  { %p1481_p11 = scmp.ne.s32.totalorder %s35_s8, %s1480_s16  ;;  %p1486_p13 = scmp.lt.s32.totalorder %s1480_s16, %s1480_s16 }
  0x1d   :  { %p1487_p0 = por %p1486_p13, %p1485_p12 }
  0x1f   :  { %p1488_p1 = pnand %p1487_p0, %p1481_p11 }
  0x21   :  { %1491 = shalt.err (!%p1488_p1)
}
  0x22   :  { %s1524_s1 = smov 8  }
  0x23   :  { %40 = dma.hbm_to_vmem [thread:$0]  %s1675_s3, 4096, %s35_s8, [#allocation6], %s1522_s29, %s1522_s29, %s1524_s1  }
  0x24   :  { %1514 = dma.done.wait [#allocation3], 32768  }
  0x25   :  { %1515 = vsyncadd [#allocation3], 4294934528 }
  0x26   :  { %1516 = dma.done.wait [#allocation6], 4096  }
  0x27   :  { %1517 = vsyncadd [#allocation6], 4294963200  ;;  %v50_v0 = vld [vmem:[#allocation2 + $0x8] sm:$0xff]  ;;  %v56_v2 = vld [vmem:[#allocation2 + $0x38] sm:$0xff]  ;;  %v342_v30 = vlaneseq }
  0x28   :  { %v66_v1 = vld [vmem:[#allocation2 + $0x88] sm:$0xff]  ;;  %v72_v4 = vld [vmem:[#allocation2 + $0xb8] sm:$0xff]  ;;  %v49_v5 = vld [vmem:[#allocation2] sm:$0xff] }
  0x29   :  { %v1139_v3 = vpack.c.bf16 %v66_v1, %v50_v0  ;;  %v65_v6 = vld [vmem:[#allocation2 + $0x80] sm:$0xff]  ;;  %v1235_v7 = vpack.c.bf16 %v72_v4, %v56_v2  ;;  %v55_v9 = vld [vmem:[#allocation2 + $0x30] sm:$0xff]  ;;  %v82_v11 = vld [vmem:[#allocation2 + $0x108] sm:$0xff]  ;;  %v1582_v37 = vshrl.u32 %v342_v30, 7  ;;  %vm1086_vm0 = vcmp.lt.s32.totalorder %v342_v30, 256 }
  0x2a   :  { %v1141_v8 = vpack.c.bf16 %v65_v6, %v49_v5  ;;  %v71_v10 = vld [vmem:[#allocation2 + $0xb0] sm:$0xff]  ;;  %v98_v13 = vld [vmem:[#allocation2 + $0x188] sm:$0xff]  ;;  %v88_v14 = vld [vmem:[#allocation2 + $0x138] sm:$0xff] }
  0x2b   :  { %1140 = vmatprep.subr.bf16.mxu1 %v1139_v3  ;;  %v1237_v12 = vpack.c.bf16 %v71_v10, %v55_v9  ;;  %v104_v15 = vld [vmem:[#allocation2 + $0x1b8] sm:$0xff]  ;;  %1236 = vmatprep.subr.bf16.mxu0 %v1235_v7  ;;  %v1143_v16 = vpack.c.bf16 %v98_v13, %v82_v11  ;;  %v81_v18 = vld [vmem:[#allocation2 + $0x100] sm:$0xff]  ;;  %v87_v20 = vld [vmem:[#allocation2 + $0x130] sm:$0xff]  ;;  %v1585_v44 = vsub.s32 1, %v1582_v37  ;;  %v372_v45 = vsub.s32 7, %v1582_v37 }
  0x2c   :  { %1142 = vmatpush1.bf16.xpose.msra.mxu1 %v1141_v8  ;;  %v1239_v17 = vpack.c.bf16 %v104_v15, %v88_v14  ;;  %v97_v19 = vld [vmem:[#allocation2 + $0x180] sm:$0xff]  ;;  %v103_v21 = vld [vmem:[#allocation2 + $0x1b0] sm:$0xff]  ;;  %v114_v22 = vld [vmem:[#allocation2 + $0x208] sm:$0xff] }
  0x2d   :  { %1238 = vmatpush1.bf16.xpose.msra.mxu0 %v1237_v12  ;;  %1144 = vmatprep.subr.bf16.mxu1 %v1143_v16  ;;  %v130_v23 = vld [vmem:[#allocation2 + $0x288] sm:$0xff]  ;;  %v120_v24 = vld [vmem:[#allocation2 + $0x238] sm:$0xff]  ;;  %v1145_v26 = vpack.c.bf16 %v97_v19, %v81_v18  ;;  %v1241_v27 = vpack.c.bf16 %v103_v21, %v87_v20  ;;  %v113_v31 = vld [vmem:[#allocation2 + $0x200] sm:$0xff] }
  0x2e   :  { %1240 = vmatprep.subr.bf16.mxu0 %v1239_v17  ;;  %v136_v25 = vld [vmem:[#allocation2 + $0x2b8] sm:$0xff]  ;;  %v1147_v28 = vpack.c.bf16 %v130_v23, %v114_v22  ;;  %v129_v32 = vld [vmem:[#allocation2 + $0x280] sm:$0xff]  ;;  %v119_v33 = vld [vmem:[#allocation2 + $0x230] sm:$0xff] }
  0x2f   :  { %v1243_v29 = vpack.c.bf16 %v136_v25, %v120_v24  ;;  %v135_v34 = vld [vmem:[#allocation2 + $0x2b0] sm:$0xff]  ;;  %v146_v35 = vld [vmem:[#allocation2 + $0x308] sm:$0xff]  ;;  %v152_v38 = vld [vmem:[#allocation2 + $0x338] sm:$0xff]  ;;  %v1149_v40 = vpack.c.bf16 %v129_v32, %v113_v31 }
  0x30   :  { %v162_v36 = vld [vmem:[#allocation2 + $0x388] sm:$0xff]  ;;  %v168_v39 = vld [vmem:[#allocation2 + $0x3b8] sm:$0xff]  ;;  %v1245_v41 = vpack.c.bf16 %v135_v34, %v119_v33  ;;  %v145_v46 = vld [vmem:[#allocation2 + $0x300] sm:$0xff] }
  0x31   :  { %v1151_v42 = vpack.c.bf16 %v162_v36, %v146_v35  ;;  %v1247_v43 = vpack.c.bf16 %v168_v39, %v152_v38  ;;  %v161_v47 = vld [vmem:[#allocation2 + $0x380] sm:$0xff]  ;;  %v151_v48 = vld [vmem:[#allocation2 + $0x330] sm:$0xff]  ;;  %v178_v51 = vld [vmem:[#allocation2 + $0x408] sm:$0xff] }
  0x32   :  { %v1591_v49 = vld [vmem:[%s1672_s0] sm:$0xff]  ;;  %v167_v50 = vld [vmem:[#allocation2 + $0x3b0] sm:$0xff]  ;;  %v194_v52 = vld [vmem:[#allocation2 + $0x488] sm:$0xff]  ;;  %v1153_v57 = vpack.c.bf16 %v161_v47, %v145_v46 }
  0x33   :  { %v349_v53 = vrot.slane %v1591_v49, %v1585_v44  ;;  %v373_v54 = vrot.slane %v1591_v49, %v372_v45  ;;  %v184_v55 = vld [vmem:[#allocation2 + $0x438] sm:$0xff]  ;;  %v1249_v58 = vpack.c.bf16 %v167_v50, %v151_v48  ;;  %v1155_v59 = vpack.c.bf16 %v194_v52, %v178_v51  ;;  %v177_v61 = vld [vmem:[#allocation2 + $0x400] sm:$0xff]  ;;  %v183_v63 = vld [vmem:[#allocation2 + $0x430] sm:$0xff] }
  0x34   :  { %1146 = vmatpush1.bf16.xpose.msra.mxu1 %v1145_v26  ;;  %v200_v56 = vld [vmem:[#allocation2 + $0x4b8] sm:$0xff]  ;;  %v193_v62 = vld [vmem:[#allocation2 + $0x480] sm:$0xff]  ;;  %v199_v0 = vld [vmem:[#allocation2 + $0x4b0] sm:$0xff]  ;;  %v1599_v50 = vsub.s32 0, %v1582_v37  ;;  %v368_v51 = vsub.s32 6, %v1582_v37 }
  0x35   :  { %1242 = vmatpush1.bf16.xpose.msra.mxu0 %v1241_v27  ;;  %1148 = vmatprep.subr.bf16.mxu1 %v1147_v28  ;;  %v1251_v60 = vpack.c.bf16 %v200_v56, %v184_v55  ;;  %v210_v1 = vld [vmem:[#allocation2 + $0x508] sm:$0xff]  ;;  %v216_v3 = vld [vmem:[#allocation2 + $0x538] sm:$0xff]  ;;  %v1157_v5 = vpack.c.bf16 %v193_v62, %v177_v61  ;;  %v1253_v6 = vpack.c.bf16 %v199_v0, %v183_v63  ;;  %v209_v9 = vld [vmem:[#allocation2 + $0x500] sm:$0xff] }
  0x36   :  { %1244 = vmatprep.subr.bf16.mxu0 %v1243_v29  ;;  %486 = vmatprep.mubr.f32.mxu1 %v349_v53  ;;  %v226_v2 = vld [vmem:[#allocation2 + $0x588] sm:$0xff]  ;;  %v232_v4 = vld [vmem:[#allocation2 + $0x5b8] sm:$0xff]  ;;  %v225_v10 = vld [vmem:[#allocation2 + $0x580] sm:$0xff]  ;;  %v369_v63 = vrot.slane %v1591_v49, %v368_v51 }
  0x37   :  { %696 = vmatprep.mubr.f32.mxu0 %v373_v54  ;;  %v1159_v7 = vpack.c.bf16 %v226_v2, %v210_v1  ;;  %v1255_v8 = vpack.c.bf16 %v232_v4, %v216_v3  ;;  %v215_v11 = vld [vmem:[#allocation2 + $0x530] sm:$0xff]  ;;  %v242_v13 = vld [vmem:[#allocation2 + $0x608] sm:$0xff]  ;;  %v248_v15 = vld [vmem:[#allocation2 + $0x638] sm:$0xff]  ;;  %v1161_v17 = vpack.c.bf16 %v225_v10, %v209_v9 }
  0x38   :  { %v231_v12 = vld [vmem:[#allocation2 + $0x5b0] sm:$0xff]  ;;  %v258_v14 = vld [vmem:[#allocation2 + $0x688] sm:$0xff]  ;;  %v264_v16 = vld [vmem:[#allocation2 + $0x6b8] sm:$0xff] }
  0x39   :  { %v1257_v18 = vpack.c.bf16 %v231_v12, %v215_v11  ;;  %v1163_v19 = vpack.c.bf16 %v258_v14, %v242_v13  ;;  %v1259_v20 = vpack.c.bf16 %v264_v16, %v248_v15  ;;  %v241_v21 = vld [vmem:[#allocation2 + $0x600] sm:$0xff]  ;;  %v247_v23 = vld [vmem:[#allocation2 + $0x630] sm:$0xff]  ;;  %v274_v25 = vld [vmem:[#allocation2 + $0x708] sm:$0xff] }
  0x3a   :  { %v257_v22 = vld [vmem:[#allocation2 + $0x680] sm:$0xff]  ;;  %v263_v24 = vld [vmem:[#allocation2 + $0x6b0] sm:$0xff]  ;;  %v290_v26 = vld [vmem:[#allocation2 + $0x788] sm:$0xff] }
  0x3b   :  { %v280_v27 = vld [vmem:[#allocation2 + $0x738] sm:$0xff]  ;;  %v1165_v29 = vpack.c.bf16 %v257_v22, %v241_v21  ;;  %v1261_v31 = vpack.c.bf16 %v263_v24, %v247_v23  ;;  %v1167_v32 = vpack.c.bf16 %v290_v26, %v274_v25  ;;  %v273_v34 = vld [vmem:[#allocation2 + $0x700] sm:$0xff]  ;;  %v279_v36 = vld [vmem:[#allocation2 + $0x730] sm:$0xff] }
  0x3c   :  { %1150 = vmatpush1.bf16.xpose.msra.mxu1 %v1149_v40  ;;  %v296_v28 = vld [vmem:[#allocation2 + $0x7b8] sm:$0xff]  ;;  %v289_v35 = vld [vmem:[#allocation2 + $0x780] sm:$0xff]  ;;  %v295_v38 = vld [vmem:[#allocation2 + $0x7b0] sm:$0xff] }
  0x3d   :  { %1246 = vmatpush1.bf16.xpose.msra.mxu0 %v1245_v41  ;;  %1152 = vmatprep.subr.bf16.mxu1 %v1151_v42  ;;  %v1263_v33 = vpack.c.bf16 %v296_v28, %v280_v27  ;;  %v52_v39 = vld [vmem:[#allocation2 + $0x18] sm:$0xff]  ;;  %v58_v41 = vld [vmem:[#allocation2 + $0x48] sm:$0xff]  ;;  %v1265_v46 = vpack.c.bf16 %v295_v38, %v279_v36  ;;  %v51_v52 = vld [vmem:[#allocation2 + $0x10] sm:$0xff] }
  0x3e   :  { %1248 = vmatprep.subr.bf16.mxu0 %v1247_v43  ;;  %v68_v40 = vld [vmem:[#allocation2 + $0x98] sm:$0xff]  ;;  %v74_v42 = vld [vmem:[#allocation2 + $0xc8] sm:$0xff]  ;;  %v1169_v43 = vpack.c.bf16 %v289_v35, %v273_v34  ;;  %v67_v53 = vld [vmem:[#allocation2 + $0x90] sm:$0xff] }
  0x3f   :  { %v1171_v47 = vpack.c.bf16 %v68_v40, %v52_v39  ;;  %v1267_v48 = vpack.c.bf16 %v74_v42, %v58_v41  ;;  %v57_v54 = vld [vmem:[#allocation2 + $0x40] sm:$0xff]  ;;  %v84_v56 = vld [vmem:[#allocation2 + $0x118] sm:$0xff]  ;;  %v106_v61 = vld [vmem:[#allocation2 + $0x1c8] sm:$0xff]  ;;  %v1173_v62 = vpack.c.bf16 %v67_v53, %v51_v52 }
  0x40   :  { %v73_v55 = vld [vmem:[#allocation2 + $0xc0] sm:$0xff]  ;;  %v1611_v0 = vld [vmem:[%s1672_s0 + $0x8] sm:$0xff]  ;;  %v116_v10 = vld [vmem:[#allocation2 + $0x218] sm:$0xff] }
  0x41   :  { %v1269_v1 = vpack.c.bf16 %v73_v55, %v57_v54  ;;  %v105_v9 = vld [vmem:[#allocation2 + $0x1c0] sm:$0xff]  ;;  %v132_v11 = vld [vmem:[#allocation2 + $0x298] sm:$0xff]  ;;  %v122_v12 = vld [vmem:[#allocation2 + $0x248] sm:$0xff] }
  0x42   :  { %v138_v13 = vld [vmem:[#allocation2 + $0x2c8] sm:$0xff]  ;;  %v1179_v16 = vpack.c.bf16 %v132_v11, %v116_v10  ;;  %v137_v21 = vld [vmem:[#allocation2 + $0x2c0] sm:$0xff]  ;;  %v148_v22 = vld [vmem:[#allocation2 + $0x318] sm:$0xff] }
  0x43   :  { %v164_v23 = vld [vmem:[#allocation2 + $0x398] sm:$0xff]  ;;  %v154_v24 = vld [vmem:[#allocation2 + $0x348] sm:$0xff]  ;;  %v169_v34 = vld [vmem:[#allocation2 + $0x3c0] sm:$0xff] }
  0x44   :  { %1154 = vmatpush1.bf16.xpose.msra.mxu1 %v1153_v57  ;;  %v100_v57 = vld [vmem:[#allocation2 + $0x198] sm:$0xff]  ;;  %v170_v25 = vld [vmem:[#allocation2 + $0x3c8] sm:$0xff]  ;;  %v1183_v28 = vpack.c.bf16 %v164_v23, %v148_v22  ;;  %v201_v52 = vld [vmem:[#allocation2 + $0x4c0] sm:$0xff] }
  0x45   :  { %1250 = vmatpush1.bf16.xpose.msra.mxu0 %v1249_v58  ;;  %1156 = vmatprep.subr.bf16.mxu1 %v1155_v59  ;;  %v356_v58 = vsub.s32 3, %v1582_v37  ;;  %v345_v59 = vrot.slane %v1591_v49, %v1599_v50  ;;  %v1175_v2 = vpack.c.bf16 %v100_v57, %v84_v56  ;;  %v180_v35 = vld [vmem:[#allocation2 + $0x418] sm:$0xff]  ;;  %v186_v38 = vld [vmem:[#allocation2 + $0x448] sm:$0xff]  ;;  %v243_v11 = vld [vmem:[#allocation2 + $0x610] sm:$0xff] }
  0x46   :  { %1252 = vmatprep.subr.bf16.mxu0 %v1251_v60  ;;  %v90_v60 = vld [vmem:[#allocation2 + $0x148] sm:$0xff]  ;;  %v196_v36 = vld [vmem:[#allocation2 + $0x498] sm:$0xff]  ;;  %v275_v23 = vld [vmem:[#allocation2 + $0x710] sm:$0xff] }
  0x47   :  { %v1271_v3 = vpack.c.bf16 %v106_v61, %v90_v60  ;;  %v357_v4 = vrot.slane %v1591_v49, %v356_v58  ;;  %v202_v39 = vld [vmem:[#allocation2 + $0x4c8] sm:$0xff]  ;;  %v1187_v42 = vpack.c.bf16 %v196_v36, %v180_v35  ;;  %v212_v53 = vld [vmem:[#allocation2 + $0x518] sm:$0xff]  ;;  %v352_v36 = vsub.s32 2, %v1582_v37 }
  0x48   :  { %v228_v54 = vld [vmem:[#allocation2 + $0x598] sm:$0xff]  ;;  %v218_v55 = vld [vmem:[#allocation2 + $0x548] sm:$0xff] }
  0x49   :  { %v234_v56 = vld [vmem:[#allocation2 + $0x5c8] sm:$0xff]  ;;  %v1191_v60 = vpack.c.bf16 %v228_v54, %v212_v53  ;;  %v377_v54 = vrot.slane %v1611_v0, %v1599_v50 }
  0x4a   :  { %v1287_v61 = vpack.c.bf16 %v234_v56, %v218_v55 }
  0x4c   :  { %1158 = vmatpush1.bf16.xpose.msra.mxu1 %v1157_v5  ;;  %v381_v5 = vrot.slane %v1611_v0, %v1585_v44 }
  0x4d   :  { %1254 = vmatpush1.bf16.xpose.msra.mxu0 %v1253_v6  ;;  %1160 = vmatprep.subr.bf16.mxu1 %v1159_v7  ;;  %v83_v6 = vld [vmem:[#allocation2 + $0x110] sm:$0xff] }
  0x4e   :  { %1256 = vmatprep.subr.bf16.mxu0 %v1255_v8  ;;  %v99_v7 = vld [vmem:[#allocation2 + $0x190] sm:$0xff]  ;;  %v89_v8 = vld [vmem:[#allocation2 + $0x140] sm:$0xff] }
  0x4f   :  { %v1177_v14 = vpack.c.bf16 %v99_v7, %v83_v6  ;;  %v1273_v15 = vpack.c.bf16 %v105_v9, %v89_v8  ;;  %v266_v6 = vld [vmem:[#allocation2 + $0x6c8] sm:$0xff] }
  0x54   :  { %1162 = vmatpush1.bf16.xpose.msra.mxu1 %v1161_v17  ;;  %v1275_v17 = vpack.c.bf16 %v138_v13, %v122_v12  ;;  %v259_v12 = vld [vmem:[#allocation2 + $0x690] sm:$0xff]  ;;  %v249_v13 = vld [vmem:[#allocation2 + $0x640] sm:$0xff] }
  0x55   :  { %1258 = vmatpush1.bf16.xpose.msra.mxu0 %v1257_v18  ;;  %1164 = vmatprep.subr.bf16.mxu1 %v1163_v19  ;;  %v115_v18 = vld [vmem:[#allocation2 + $0x210] sm:$0xff] }
  0x56   :  { %1260 = vmatprep.subr.bf16.mxu0 %v1259_v20  ;;  %v131_v19 = vld [vmem:[#allocation2 + $0x290] sm:$0xff]  ;;  %v121_v20 = vld [vmem:[#allocation2 + $0x240] sm:$0xff] }
  0x57   :  { %v1181_v26 = vpack.c.bf16 %v131_v19, %v115_v18  ;;  %v1277_v27 = vpack.c.bf16 %v137_v21, %v121_v20  ;;  %v298_v18 = vld [vmem:[#allocation2 + $0x7c8] sm:$0xff]  ;;  %v1197_v19 = vpack.c.bf16 %v259_v12, %v243_v11  ;;  %v123_v11 = vld [vmem:[#allocation2 + $0x250] sm:$0xff] }
  0x58   :  { %v139_v12 = vld [vmem:[#allocation2 + $0x2d0] sm:$0xff] }
  0x5c   :  { %1166 = vmatpush1.bf16.xpose.msra.mxu1 %v1165_v29  ;;  %v1279_v29 = vpack.c.bf16 %v170_v25, %v154_v24  ;;  %v291_v24 = vld [vmem:[#allocation2 + $0x790] sm:$0xff]  ;;  %v281_v25 = vld [vmem:[#allocation2 + $0x740] sm:$0xff] }
  0x5d   :  { %1262 = vmatpush1.bf16.xpose.msra.mxu0 %v1261_v31  ;;  %1168 = vmatprep.subr.bf16.mxu1 %v1167_v32  ;;  %v147_v31 = vld [vmem:[#allocation2 + $0x310] sm:$0xff] }
  0x5e   :  { %1264 = vmatprep.subr.bf16.mxu0 %v1263_v33  ;;  %v163_v32 = vld [vmem:[#allocation2 + $0x390] sm:$0xff]  ;;  %v153_v33 = vld [vmem:[#allocation2 + $0x340] sm:$0xff] }
  0x5f   :  { %v1185_v40 = vpack.c.bf16 %v163_v32, %v147_v31  ;;  %v1281_v41 = vpack.c.bf16 %v169_v34, %v153_v33  ;;  %v76_v31 = vld [vmem:[#allocation2 + $0xd8] sm:$0xff]  ;;  %v1201_v32 = vpack.c.bf16 %v291_v24, %v275_v23  ;;  %v155_v23 = vld [vmem:[#allocation2 + $0x350] sm:$0xff] }
  0x60   :  { %v171_v24 = vld [vmem:[#allocation2 + $0x3d0] sm:$0xff] }
  0x64   :  { %1170 = vmatpush1.bf16.xpose.msra.mxu1 %v1169_v43  ;;  %v1283_v43 = vpack.c.bf16 %v202_v39, %v186_v38  ;;  %v53_v38 = vld [vmem:[#allocation2 + $0x20] sm:$0xff] }
  0x65   :  { %1266 = vmatpush1.bf16.xpose.msra.mxu0 %v1265_v46  ;;  %1172 = vmatprep.subr.bf16.mxu1 %v1171_v47  ;;  %v179_v46 = vld [vmem:[#allocation2 + $0x410] sm:$0xff]  ;;  %v69_v39 = vld [vmem:[#allocation2 + $0xa0] sm:$0xff] }
  0x66   :  { %1268 = vmatprep.subr.bf16.mxu0 %v1267_v48  ;;  %v195_v47 = vld [vmem:[#allocation2 + $0x490] sm:$0xff]  ;;  %v185_v48 = vld [vmem:[#allocation2 + $0x440] sm:$0xff]  ;;  %v1205_v53 = vpack.c.bf16 %v69_v39, %v53_v38 }
  0x67   :  { %v1189_v57 = vpack.c.bf16 %v195_v47, %v179_v46  ;;  %v364_v46 = vsub.s32 5, %v1582_v37  ;;  %v353_v47 = vrot.slane %v1591_v49, %v352_v36  ;;  %v187_v38 = vld [vmem:[#allocation2 + $0x450] sm:$0xff] }
  0x68   :  { %v203_v39 = vld [vmem:[#allocation2 + $0x4d0] sm:$0xff] }
  0x6b   :  { %487 = vmatmul.mubr.f32.vlgmr.msra.gmra.mrb[0].mxu1 %v345_v59  ;;  %v1285_v59 = vpack.c.bf16 %v201_v52, %v185_v48  ;;  %v92_v48 = vld [vmem:[#allocation2 + $0x158] sm:$0xff] }
  0x6c   :  { %1174 = vmatpush1.bf16.xpose.msra.mxu1 %v1173_v62  ;;  %697 = vmatmul.mubr.f32.vlgmr.msra.gmra.mrb[0].mxu0 %v369_v63  ;;  %v211_v62 = vld [vmem:[#allocation2 + $0x510] sm:$0xff]  ;;  %v108_v52 = vld [vmem:[#allocation2 + $0x1d8] sm:$0xff] }
  0x6d   :  { %1270 = vmatpush1.bf16.xpose.msra.mxu0 %v1269_v1  ;;  %1176 = vmatprep.subr.bf16.mxu1 %v1175_v2  ;;  %v227_v63 = vld [vmem:[#allocation2 + $0x590] sm:$0xff]  ;;  %v217_v1 = vld [vmem:[#allocation2 + $0x540] sm:$0xff] }
  0x6e   :  { %1272 = vmatprep.subr.bf16.mxu0 %v1271_v3  ;;  %556 = vmatprep.mubr.f32.mxu1 %v357_v4  ;;  %v233_v2 = vld [vmem:[#allocation2 + $0x5c0] sm:$0xff]  ;;  %v244_v3 = vld [vmem:[#allocation2 + $0x618] sm:$0xff]  ;;  %v1193_v7 = vpack.c.bf16 %v227_v63, %v211_v62  ;;  %v91_v63 = vld [vmem:[#allocation2 + $0x150] sm:$0xff] }
  0x6f   :  { %766 = vmatprep.mubr.f32.mxu0 %v381_v5  ;;  %v260_v4 = vld [vmem:[#allocation2 + $0x698] sm:$0xff]  ;;  %v250_v5 = vld [vmem:[#allocation2 + $0x648] sm:$0xff]  ;;  %v1289_v8 = vpack.c.bf16 %v233_v2, %v217_v1  ;;  %v101_v62 = vld [vmem:[#allocation2 + $0x1a0] sm:$0xff] }
  0x70   :  { %v1195_v9 = vpack.c.bf16 %v260_v4, %v244_v3  ;;  %v1291_v10 = vpack.c.bf16 %v266_v6, %v250_v5  ;;  %v107_v1 = vld [vmem:[#allocation2 + $0x1d0] sm:$0xff]  ;;  %v118_v2 = vld [vmem:[#allocation2 + $0x228] sm:$0xff]  ;;  %v124_v4 = vld [vmem:[#allocation2 + $0x258] sm:$0xff] }
  0x71   :  { %v134_v3 = vld [vmem:[#allocation2 + $0x2a8] sm:$0xff]  ;;  %v140_v5 = vld [vmem:[#allocation2 + $0x2d8] sm:$0xff] }
  0x74   :  { %1178 = vmatpush1.bf16.xpose.msra.mxu1 %v1177_v14  ;;  %v265_v14 = vld [vmem:[#allocation2 + $0x6c0] sm:$0xff] }
  0x75   :  { %1274 = vmatpush1.bf16.xpose.msra.mxu0 %v1273_v15  ;;  %1180 = vmatprep.subr.bf16.mxu1 %v1179_v16  ;;  %v276_v15 = vld [vmem:[#allocation2 + $0x718] sm:$0xff]  ;;  %v1293_v20 = vpack.c.bf16 %v265_v14, %v249_v13  ;;  %v150_v13 = vld [vmem:[#allocation2 + $0x328] sm:$0xff] }
  0x76   :  { %1276 = vmatprep.subr.bf16.mxu0 %v1275_v17  ;;  %v292_v16 = vld [vmem:[#allocation2 + $0x798] sm:$0xff]  ;;  %v282_v17 = vld [vmem:[#allocation2 + $0x748] sm:$0xff] }
  0x77   :  { %v1199_v21 = vpack.c.bf16 %v292_v16, %v276_v15  ;;  %v1295_v22 = vpack.c.bf16 %v298_v18, %v282_v17  ;;  %v166_v14 = vld [vmem:[#allocation2 + $0x3a8] sm:$0xff]  ;;  %v156_v15 = vld [vmem:[#allocation2 + $0x358] sm:$0xff]  ;;  %v1309_v18 = vpack.c.bf16 %v139_v12, %v123_v11 }
  0x78   :  { %v172_v16 = vld [vmem:[#allocation2 + $0x3d8] sm:$0xff] }
  0x7c   :  { %1182 = vmatpush1.bf16.xpose.msra.mxu1 %v1181_v26  ;;  %v297_v26 = vld [vmem:[#allocation2 + $0x7c0] sm:$0xff] }
  0x7d   :  { %1278 = vmatpush1.bf16.xpose.msra.mxu0 %v1277_v27  ;;  %1184 = vmatprep.subr.bf16.mxu1 %v1183_v28  ;;  %v54_v27 = vld [vmem:[#allocation2 + $0x28] sm:$0xff]  ;;  %v1297_v33 = vpack.c.bf16 %v297_v26, %v281_v25 }
  0x7e   :  { %1280 = vmatprep.subr.bf16.mxu0 %v1279_v29  ;;  %v70_v28 = vld [vmem:[#allocation2 + $0xa8] sm:$0xff]  ;;  %v60_v29 = vld [vmem:[#allocation2 + $0x58] sm:$0xff] }
  0x7f   :  { %v1203_v34 = vpack.c.bf16 %v70_v28, %v54_v27  ;;  %v1299_v35 = vpack.c.bf16 %v76_v31, %v60_v29  ;;  %v182_v25 = vld [vmem:[#allocation2 + $0x428] sm:$0xff]  ;;  %v188_v27 = vld [vmem:[#allocation2 + $0x458] sm:$0xff]  ;;  %v1313_v31 = vpack.c.bf16 %v171_v24, %v155_v23  ;;  %v360_v24 = vsub.s32 4, %v1582_v37 }
  0x80   :  { %v198_v26 = vld [vmem:[#allocation2 + $0x4a8] sm:$0xff]  ;;  %v204_v28 = vld [vmem:[#allocation2 + $0x4d8] sm:$0xff] }
  0x84   :  { %1186 = vmatpush1.bf16.xpose.msra.mxu1 %v1185_v40  ;;  %v59_v40 = vld [vmem:[#allocation2 + $0x50] sm:$0xff] }
  0x85   :  { %1282 = vmatpush1.bf16.xpose.msra.mxu0 %v1281_v41  ;;  %1188 = vmatprep.subr.bf16.mxu1 %v1187_v42  ;;  %v75_v41 = vld [vmem:[#allocation2 + $0xd0] sm:$0xff]  ;;  %v86_v42 = vld [vmem:[#allocation2 + $0x128] sm:$0xff] }
  0x86   :  { %1284 = vmatprep.subr.bf16.mxu0 %v1283_v43  ;;  %v102_v43 = vld [vmem:[#allocation2 + $0x1a8] sm:$0xff]  ;;  %v1301_v55 = vpack.c.bf16 %v75_v41, %v59_v40 }
  0x87   :  { %v1207_v56 = vpack.c.bf16 %v102_v43, %v86_v42  ;;  %v214_v40 = vld [vmem:[#allocation2 + $0x528] sm:$0xff]  ;;  %v220_v42 = vld [vmem:[#allocation2 + $0x558] sm:$0xff] }
  0x88   :  { %v230_v41 = vld [vmem:[#allocation2 + $0x5a8] sm:$0xff]  ;;  %v236_v43 = vld [vmem:[#allocation2 + $0x5d8] sm:$0xff] }
  0x8c   :  { %1190 = vmatpush1.bf16.xpose.msra.mxu1 %v1189_v57  ;;  %v1303_v57 = vpack.c.bf16 %v108_v52, %v92_v48  ;;  %v1317_v48 = vpack.c.bf16 %v203_v39, %v187_v38  ;;  %v1223_v52 = vpack.c.bf16 %v230_v41, %v214_v40  ;;  %v109_v38 = vld [vmem:[#allocation2 + $0x1e0] sm:$0xff]  ;;  %v142_v39 = vld [vmem:[#allocation2 + $0x2e8] sm:$0xff] }
  0x8d   :  { %1286 = vmatpush1.bf16.xpose.msra.mxu0 %v1285_v59  ;;  %1192 = vmatprep.subr.bf16.mxu1 %v1191_v60  ;;  %v365_v59 = vrot.slane %v1591_v49, %v364_v46  ;;  %v389_v60 = vrot.slane %v1611_v0, %v356_v58  ;;  %v117_v58 = vld [vmem:[#allocation2 + $0x220] sm:$0xff] }
  0x8e   :  { %1288 = vmatprep.subr.bf16.mxu0 %v1287_v61  ;;  %v85_v61 = vld [vmem:[#allocation2 + $0x120] sm:$0xff] }
  0x8f   :  { %v1209_v6 = vpack.c.bf16 %v101_v62, %v85_v61  ;;  %v252_v61 = vld [vmem:[#allocation2 + $0x658] sm:$0xff] }
  0x90   :  { %v268_v62 = vld [vmem:[#allocation2 + $0x6d8] sm:$0xff] }
  0x94   :  { %1194 = vmatpush1.bf16.xpose.msra.mxu1 %v1193_v7  ;;  %v1305_v7 = vpack.c.bf16 %v107_v1, %v91_v63 }
  0x95   :  { %1290 = vmatpush1.bf16.xpose.msra.mxu0 %v1289_v8  ;;  %1196 = vmatprep.subr.bf16.mxu1 %v1195_v9  ;;  %v1211_v8 = vpack.c.bf16 %v134_v3, %v118_v2  ;;  %v1307_v9 = vpack.c.bf16 %v140_v5, %v124_v4  ;;  %v1323_v3 = vpack.c.bf16 %v268_v62, %v252_v61  ;;  %v245_v4 = vld [vmem:[#allocation2 + $0x620] sm:$0xff]  ;;  %v222_v61 = vld [vmem:[#allocation2 + $0x568] sm:$0xff] }
  0x96   :  { %1292 = vmatprep.subr.bf16.mxu0 %v1291_v10  ;;  %v133_v10 = vld [vmem:[#allocation2 + $0x2a0] sm:$0xff]  ;;  %v238_v62 = vld [vmem:[#allocation2 + $0x5e8] sm:$0xff] }
  0x97   :  { %v1213_v17 = vpack.c.bf16 %v133_v10, %v117_v58  ;;  %v261_v5 = vld [vmem:[#allocation2 + $0x6a0] sm:$0xff]  ;;  %v284_v58 = vld [vmem:[#allocation2 + $0x758] sm:$0xff] }
  0x98   :  { %v300_v10 = vld [vmem:[#allocation2 + $0x7d8] sm:$0xff]  ;;  %v1229_v11 = vpack.c.bf16 %v261_v5, %v245_v4  ;;  %v254_v4 = vld [vmem:[#allocation2 + $0x668] sm:$0xff] }
  0x99   :  { %v270_v5 = vld [vmem:[#allocation2 + $0x6e8] sm:$0xff] }
  0x9c   :  { %1198 = vmatpush1.bf16.xpose.msra.mxu1 %v1197_v19  ;;  %v1215_v19 = vpack.c.bf16 %v166_v14, %v150_v13  ;;  %v1327_v14 = vpack.c.bf16 %v300_v10, %v284_v58  ;;  %v286_v58 = vld [vmem:[#allocation2 + $0x768] sm:$0xff] }
  0x9d   :  { %1294 = vmatpush1.bf16.xpose.msra.mxu0 %v1293_v20  ;;  %1200 = vmatprep.subr.bf16.mxu1 %v1199_v21  ;;  %v1311_v20 = vpack.c.bf16 %v172_v16, %v156_v15  ;;  %v149_v21 = vld [vmem:[#allocation2 + $0x320] sm:$0xff]  ;;  %v302_v10 = vld [vmem:[#allocation2 + $0x7e8] sm:$0xff] }
  0x9e   :  { %1296 = vmatprep.subr.bf16.mxu0 %v1295_v22  ;;  %v165_v22 = vld [vmem:[#allocation2 + $0x3a0] sm:$0xff] }
  0x9f   :  { %v1217_v29 = vpack.c.bf16 %v165_v22, %v149_v21  ;;  %v277_v15 = vld [vmem:[#allocation2 + $0x720] sm:$0xff] }
  0xa0   :  { %v293_v16 = vld [vmem:[#allocation2 + $0x7a0] sm:$0xff] }
  0xa1   :  { %v1233_v21 = vpack.c.bf16 %v293_v16, %v277_v15  ;;  %v64_v15 = vld [vmem:[#allocation2 + $0x78] sm:$0xff] }
  0xa2   :  { %v80_v16 = vld [vmem:[#allocation2 + $0xf8] sm:$0xff] }
  0xa4   :  { %1202 = vmatpush1.bf16.xpose.msra.mxu1 %v1201_v32  ;;  %v1219_v32 = vpack.c.bf16 %v198_v26, %v182_v25  ;;  %v61_v25 = vld [vmem:[#allocation2 + $0x60] sm:$0xff] }
  0xa5   :  { %1298 = vmatpush1.bf16.xpose.msra.mxu0 %v1297_v33  ;;  %1204 = vmatprep.subr.bf16.mxu1 %v1203_v34  ;;  %v1315_v33 = vpack.c.bf16 %v204_v28, %v188_v27  ;;  %v181_v34 = vld [vmem:[#allocation2 + $0x420] sm:$0xff]  ;;  %v361_v27 = vrot.slane %v1591_v49, %v360_v24  ;;  %v94_v28 = vld [vmem:[#allocation2 + $0x168] sm:$0xff] }
  0xa6   :  { %1300 = vmatprep.subr.bf16.mxu0 %v1299_v35  ;;  %v197_v35 = vld [vmem:[#allocation2 + $0x4a0] sm:$0xff]  ;;  %v126_v49 = vld [vmem:[#allocation2 + $0x268] sm:$0xff] }
  0xa7   :  { %v77_v26 = vld [vmem:[#allocation2 + $0xe0] sm:$0xff]  ;;  %v1339_v41 = vpack.c.bf16 %v142_v39, %v126_v49  ;;  %v176_v49 = vld [vmem:[#allocation2 + $0x3f8] sm:$0xff] }
  0xab   :  { %557 = vmatmul.mubr.f32.vlgmr.msra.gmra.mrb[0].mxu1 %v353_v47  ;;  %v1221_v47 = vpack.c.bf16 %v197_v35, %v181_v34  ;;  %v93_v35 = vld [vmem:[#allocation2 + $0x160] sm:$0xff] }
  0xac   :  { %1206 = vmatpush1.bf16.xpose.msra.mxu1 %v1205_v53  ;;  %767 = vmatmul.mubr.f32.vlgmr.msra.gmra.mrb[0].mxu0 %v377_v54  ;;  %v1319_v53 = vpack.c.bf16 %v236_v43, %v220_v42  ;;  %v213_v54 = vld [vmem:[#allocation2 + $0x520] sm:$0xff]  ;;  %v1337_v40 = vpack.c.bf16 %v109_v38, %v93_v35  ;;  %v158_v43 = vld [vmem:[#allocation2 + $0x368] sm:$0xff]  ;;  %v127_v35 = vld [vmem:[#allocation2 + $0x270] sm:$0xff] }
  0xad   :  { %1302 = vmatpush1.bf16.xpose.msra.mxu0 %v1301_v55  ;;  %1208 = vmatprep.subr.bf16.mxu1 %v1207_v56  ;;  %v229_v55 = vld [vmem:[#allocation2 + $0x5a0] sm:$0xff]  ;;  %v219_v56 = vld [vmem:[#allocation2 + $0x550] sm:$0xff]  ;;  %v160_v38 = vld [vmem:[#allocation2 + $0x378] sm:$0xff] }
  0xae   :  { %1304 = vmatprep.subr.bf16.mxu0 %v1303_v57  ;;  %626 = vmatprep.mubr.f32.mxu1 %v365_v59  ;;  %v235_v57 = vld [vmem:[#allocation2 + $0x5d0] sm:$0xff]  ;;  %v246_v59 = vld [vmem:[#allocation2 + $0x628] sm:$0xff]  ;;  %v1225_v63 = vpack.c.bf16 %v229_v55, %v213_v54  ;;  %v141_v42 = vld [vmem:[#allocation2 + $0x2e0] sm:$0xff] }
  0xaf   :  { %836 = vmatprep.mubr.f32.mxu0 %v389_v60  ;;  %v262_v60 = vld [vmem:[#allocation2 + $0x6a8] sm:$0xff]  ;;  %v1321_v1 = vpack.c.bf16 %v235_v57, %v219_v56 }
  0xb0   :  { %v1227_v2 = vpack.c.bf16 %v262_v60, %v246_v59  ;;  %v190_v54 = vld [vmem:[#allocation2 + $0x468] sm:$0xff]  ;;  %v189_v59 = vld [vmem:[#allocation2 + $0x460] sm:$0xff] }
  0xb1   :  { %v206_v55 = vld [vmem:[#allocation2 + $0x4e8] sm:$0xff]  ;;  %v205_v60 = vld [vmem:[#allocation2 + $0x4e0] sm:$0xff] }
  0xb2   :  { %v1347_v57 = vpack.c.bf16 %v206_v55, %v190_v54  ;;  %v324_v54 = vld [vmem:[#allocation5 + $0x98] sm:$0xff] }
  0xb4   :  { %1210 = vmatpush1.bf16.xpose.msra.mxu1 %v1209_v6  ;;  %v251_v6 = vld [vmem:[#allocation2 + $0x650] sm:$0xff] }
  0xb5   :  { %1306 = vmatpush1.bf16.xpose.msra.mxu0 %v1305_v7  ;;  %1212 = vmatprep.subr.bf16.mxu1 %v1211_v8  ;;  %v267_v7 = vld [vmem:[#allocation2 + $0x6d0] sm:$0xff]  ;;  %v278_v8 = vld [vmem:[#allocation2 + $0x728] sm:$0xff] }
  0xb6   :  { %1308 = vmatprep.subr.bf16.mxu0 %v1307_v9  ;;  %v294_v9 = vld [vmem:[#allocation2 + $0x7a8] sm:$0xff]  ;;  %v1325_v12 = vpack.c.bf16 %v267_v7, %v251_v6  ;;  %v1355_v7 = vpack.c.bf16 %v270_v5, %v254_v4  ;;  %v240_v4 = vld [vmem:[#allocation2 + $0x5f8] sm:$0xff] }
  0xb7   :  { %v1231_v13 = vpack.c.bf16 %v294_v9, %v278_v8  ;;  %v253_v8 = vld [vmem:[#allocation2 + $0x660] sm:$0xff] }
  0xb8   :  { %v269_v9 = vld [vmem:[#allocation2 + $0x6e0] sm:$0xff] }
  0xbc   :  { %1214 = vmatpush1.bf16.xpose.msra.mxu1 %v1213_v17  ;;  %v283_v17 = vld [vmem:[#allocation2 + $0x750] sm:$0xff] }
  0xbd   :  { %1310 = vmatpush1.bf16.xpose.msra.mxu0 %v1309_v18  ;;  %1216 = vmatprep.subr.bf16.mxu1 %v1215_v19  ;;  %v299_v18 = vld [vmem:[#allocation2 + $0x7d0] sm:$0xff]  ;;  %v62_v19 = vld [vmem:[#allocation2 + $0x68] sm:$0xff] }
  0xbe   :  { %1312 = vmatprep.subr.bf16.mxu0 %v1311_v20  ;;  %v78_v20 = vld [vmem:[#allocation2 + $0xe8] sm:$0xff]  ;;  %v1329_v22 = vpack.c.bf16 %v299_v18, %v283_v17  ;;  %v1363_v18 = vpack.c.bf16 %v80_v16, %v64_v15  ;;  %v272_v15 = vld [vmem:[#allocation2 + $0x6f8] sm:$0xff] }
  0xbf   :  { %v1331_v23 = vpack.c.bf16 %v78_v20, %v62_v19  ;;  %v63_v19 = vld [vmem:[#allocation2 + $0x70] sm:$0xff] }
  0xc0   :  { %v79_v20 = vld [vmem:[#allocation2 + $0xf0] sm:$0xff] }
  0xc4   :  { %1218 = vmatpush1.bf16.xpose.msra.mxu1 %v1217_v29  ;;  %v110_v29 = vld [vmem:[#allocation2 + $0x1e8] sm:$0xff] }
  0xc5   :  { %1314 = vmatpush1.bf16.xpose.msra.mxu0 %v1313_v31  ;;  %1220 = vmatprep.subr.bf16.mxu1 %v1219_v32  ;;  %v385_v31 = vrot.slane %v1611_v0, %v352_v36  ;;  %v1333_v32 = vpack.c.bf16 %v77_v26, %v61_v25  ;;  %v1335_v34 = vpack.c.bf16 %v110_v29, %v94_v28  ;;  %v125_v36 = vld [vmem:[#allocation2 + $0x260] sm:$0xff]  ;;  %v95_v28 = vld [vmem:[#allocation2 + $0x170] sm:$0xff] }
  0xc6   :  { %1316 = vmatprep.subr.bf16.mxu0 %v1315_v33  ;;  %v397_v33 = vrot.slane %v1611_v0, %v364_v46  ;;  %v1365_v25 = vpack.c.bf16 %v79_v20, %v63_v19  ;;  %v405_v26 = vrot.slane %v1611_v0, %v372_v45  ;;  %v111_v29 = vld [vmem:[#allocation2 + $0x1f0] sm:$0xff] }
  0xc7   :  { %v159_v45 = vld [vmem:[#allocation2 + $0x370] sm:$0xff] }
  0xc8   :  { %v311_v20 = vld [vmem:[#allocation5 + $0x30] sm:$0xff] }
  0xcc   :  { %1222 = vmatpush1.bf16.xpose.msra.mxu1 %v1221_v47  ;;  %v174_v47 = vld [vmem:[#allocation2 + $0x3e8] sm:$0xff] }
  0xcd   :  { %1318 = vmatpush1.bf16.xpose.msra.mxu0 %v1317_v48  ;;  %1224 = vmatprep.subr.bf16.mxu1 %v1223_v52  ;;  %v1341_v48 = vpack.c.bf16 %v141_v42, %v125_v36  ;;  %v1343_v46 = vpack.c.bf16 %v174_v47, %v158_v43  ;;  %v157_v52 = vld [vmem:[#allocation2 + $0x360] sm:$0xff]  ;;  %v192_v36 = vld [vmem:[#allocation2 + $0x478] sm:$0xff]  ;;  %v322_v47 = vld [vmem:[#allocation5 + $0x88] sm:$0xff] }
  0xce   :  { %1320 = vmatprep.subr.bf16.mxu0 %v1319_v53  ;;  %v173_v53 = vld [vmem:[#allocation2 + $0x3e0] sm:$0xff]  ;;  %v208_v42 = vld [vmem:[#allocation2 + $0x4f8] sm:$0xff] }
  0xcf   :  { %v1345_v56 = vpack.c.bf16 %v173_v53, %v157_v52  ;;  %v321_v43 = vld [vmem:[#allocation5 + $0x80] sm:$0xff]  ;;  %v306_v52 = vld [vmem:[#allocation5 + $0x8] sm:$0xff]  ;;  %v323_v53 = vld [vmem:[#allocation5 + $0x90] sm:$0xff] }
  0xd4   :  { %1226 = vmatpush1.bf16.xpose.msra.mxu1 %v1225_v63  ;;  %v1349_v63 = vpack.c.bf16 %v205_v60, %v189_v59  ;;  %v1379_v59 = vpack.c.bf16 %v208_v42, %v192_v36  ;;  %v307_v60 = vld [vmem:[#allocation5 + $0x10] sm:$0xff]  ;;  %v316_v42 = vld [vmem:[#allocation5 + $0x58] sm:$0xff] }
  0xd5   :  { %1322 = vmatpush1.bf16.xpose.msra.mxu0 %v1321_v1  ;;  %1228 = vmatprep.subr.bf16.mxu1 %v1227_v2  ;;  %v1351_v1 = vpack.c.bf16 %v238_v62, %v222_v61  ;;  %v221_v2 = vld [vmem:[#allocation2 + $0x560] sm:$0xff]  ;;  %v308_v61 = vld [vmem:[#allocation5 + $0x18] sm:$0xff]  ;;  %v315_v36 = vld [vmem:[#allocation5 + $0x50] sm:$0xff] }
  0xd6   :  { %1324 = vmatprep.subr.bf16.mxu0 %v1323_v3  ;;  %v237_v3 = vld [vmem:[#allocation2 + $0x5e0] sm:$0xff]  ;;  %v1401_v5 = vpack.c.bf16 %v308_v61, %v307_v60  ;;  %v319_v60 = vld [vmem:[#allocation5 + $0x70] sm:$0xff]  ;;  %v320_v61 = vld [vmem:[#allocation5 + $0x78] sm:$0xff] }
  0xd7   :  { %v1353_v6 = vpack.c.bf16 %v237_v3, %v221_v2  ;;  %v325_v62 = vld [vmem:[#allocation5 + $0xa0] sm:$0xff]  ;;  %v207_v2 = vld [vmem:[#allocation2 + $0x4f0] sm:$0xff]  ;;  %v224_v3 = vld [vmem:[#allocation2 + $0x578] sm:$0xff] }
  0xdc   :  { %1230 = vmatpush1.bf16.xpose.msra.mxu1 %v1229_v11  ;;  %v1357_v11 = vpack.c.bf16 %v269_v9, %v253_v8  ;;  %v1383_v8 = vpack.c.bf16 %v240_v4, %v224_v3  ;;  %v309_v9 = vld [vmem:[#allocation5 + $0x20] sm:$0xff] }
  0xdd   :  { %1326 = vmatpush1.bf16.xpose.msra.mxu0 %v1325_v12  ;;  %1232 = vmatprep.subr.bf16.mxu1 %v1231_v13  ;;  %v1359_v12 = vpack.c.bf16 %v302_v10, %v286_v58  ;;  %v285_v13 = vld [vmem:[#allocation2 + $0x760] sm:$0xff]  ;;  %v310_v58 = vld [vmem:[#allocation5 + $0x28] sm:$0xff]  ;;  %v327_v10 = vld [vmem:[#allocation5 + $0xb0] sm:$0xff] }
  0xde   :  { %1328 = vmatprep.subr.bf16.mxu0 %v1327_v14  ;;  %v301_v14 = vld [vmem:[#allocation2 + $0x7e0] sm:$0xff]  ;;  %v1405_v16 = vpack.c.bf16 %v310_v58, %v309_v9 }
  0xdf   :  { %v1361_v17 = vpack.c.bf16 %v301_v14, %v285_v13  ;;  %v239_v13 = vld [vmem:[#allocation2 + $0x5f0] sm:$0xff]  ;;  %v256_v14 = vld [vmem:[#allocation2 + $0x678] sm:$0xff] }
  0xe0   :  { %v1387_v19 = vpack.c.bf16 %v272_v15, %v256_v14 }
  0xe4   :  { %1234 = vmatpush1.bf16.xpose.msra.mxu1 %v1233_v21  ;;  %v96_v21 = vld [vmem:[#allocation2 + $0x178] sm:$0xff] }
  0xe5   :  { %1330 = vmatpush1.bf16.xpose.msra.mxu0 %v1329_v22  ;;  %v112_v22 = vld [vmem:[#allocation2 + $0x1f8] sm:$0xff] }
  0xe6   :  { %1332 = vmatprep.subr.bf16.mxu0 %v1331_v23  ;;  %v393_v23 = vrot.slane %v1611_v0, %v360_v24  ;;  %v143_v24 = vld [vmem:[#allocation2 + $0x2f0] sm:$0xff] }
  0xe7   :  { %v1373_v39 = vpack.c.bf16 %v143_v24, %v127_v35  ;;  %v314_v35 = vld [vmem:[#allocation5 + $0x48] sm:$0xff]  ;;  %v331_v24 = vld [vmem:[#allocation5 + $0xd0] sm:$0xff] }
  0xeb   :  { %627 = vmatmul.mubr.f32.vlgmr.msra.gmra.mrb[0].mxu1 %v361_v27  ;;  %v1367_v27 = vpack.c.bf16 %v112_v22, %v96_v21  ;;  %v312_v21 = vld [vmem:[#allocation5 + $0x38] sm:$0xff]  ;;  %v329_v22 = vld [vmem:[#allocation5 + $0xc0] sm:$0xff] }
  0xec   :  { %837 = vmatmul.mubr.f32.vlgmr.msra.gmra.mrb[0].mxu0 %v385_v31  ;;  %v128_v31 = vld [vmem:[#allocation2 + $0x278] sm:$0xff] }
  0xed   :  { %1334 = vmatpush1.bf16.xpose.msra.mxu0 %v1333_v32  ;;  %906 = vmatprep.mubr.f32.mxu0 %v397_v33  ;;  %v144_v32 = vld [vmem:[#allocation2 + $0x2f8] sm:$0xff]  ;;  %v1369_v33 = vpack.c.bf16 %v111_v29, %v95_v28  ;;  %v1409_v29 = vpack.c.bf16 %v312_v21, %v311_v20 }
  0xee   :  { %1336 = vmatprep.subr.bf16.mxu0 %v1335_v34  ;;  %v1371_v34 = vpack.c.bf16 %v144_v32, %v128_v31  ;;  %v304_v28 = vld [vmem:[#allocation2 + $0x7f8] sm:$0xff] }
  0xf5   :  { %1338 = vmatpush1.bf16.xpose.msra.mxu0 %v1337_v40  ;;  %v1375_v40 = vpack.c.bf16 %v176_v49, %v160_v38  ;;  %v332_v38 = vld [vmem:[#allocation5 + $0xd8] sm:$0xff]  ;;  %v287_v49 = vld [vmem:[#allocation2 + $0x770] sm:$0xff] }
  0xf6   :  { %1340 = vmatprep.subr.bf16.mxu0 %v1339_v41  ;;  %v175_v41 = vld [vmem:[#allocation2 + $0x3f0] sm:$0xff] }
  0xf7   :  { %v1377_v55 = vpack.c.bf16 %v175_v41, %v159_v45  ;;  %v1415_v45 = vpack.c.bf16 %v332_v38, %v331_v24 }
  0xfd   :  { %1342 = vmatpush1.bf16.xpose.msra.mxu0 %v1341_v48  ;;  %v305_v48 = vld [vmem:[#allocation5] sm:$0xff] }
  0xfe   :  { %1344 = vmatprep.subr.bf16.mxu0 %v1343_v46  ;;  %v1395_v46 = vpack.c.bf16 %v322_v47, %v321_v43  ;;  %v333_v43 = vld [vmem:[#allocation5 + $0xe0] sm:$0xff]  ;;  %v334_v47 = vld [vmem:[#allocation5 + $0xe8] sm:$0xff] }
 0x100   :  { %1396 = vmatprep.subr.bf16.mxu1 %v1395_v46  ;;  %v401_v46 = vrot.slane %v1611_v0, %v368_v51  ;;  %v339_v51 = vld [vmem:[%s1674_s2] sm:$0x1]  ;;  %s1526_s2 = smov [#allocation7]  }
 0x101   :  { %s1095_s25 = sshll.u32 %s1526_s2, 4  ;;  %s1096_s25 = int_to_ptr.vmem [resolvable:$true] %s1095_s25 }
 0x102   :  { %p1497_p3 = scmp.lt.s32.totalorder %s1096_s25, %s1096_s25 }
 0x105   :  { %1346 = vmatpush1.bf16.xpose.msra.mxu0 %v1345_v56  ;;  %v1397_v56 = vpack.c.bf16 %v306_v52, %v305_v48  ;;  %v1417_v48 = vpack.c.bf16 %v316_v42, %v315_v36  ;;  %v1419_v52 = vpack.c.bf16 %v334_v47, %v333_v43 }
 0x106   :  { %1348 = vmatprep.subr.bf16.mxu0 %v1347_v57  ;;  %v1399_v57 = vpack.c.bf16 %v324_v54, %v323_v53  ;;  %v317_v53 = vld [vmem:[#allocation5 + $0x60] sm:$0xff]  ;;  %v318_v54 = vld [vmem:[#allocation5 + $0x68] sm:$0xff] }
 0x107   :  { %1398 = vmatpush3.bf16.xpose.msra.mxu1 %v1397_v56  ;;  %v336_v56 = vld [vmem:[#allocation5 + $0xf8] sm:$0xff] }
 0x108   :  { %1400 = vmatprep.subr.bf16.mxu1 %v1399_v57  ;;  %v1421_v57 = vpack.c.bf16 %v318_v54, %v317_v53 }
 0x10d   :  { %1350 = vmatpush1.bf16.xpose.msra.mxu0 %v1349_v63  ;;  %v326_v63 = vld [vmem:[#allocation5 + $0xa8] sm:$0xff] }
 0x10e   :  { %1352 = vmatprep.subr.bf16.mxu0 %v1351_v1  ;;  %v191_v1 = vld [vmem:[#allocation2 + $0x470] sm:$0xff] }
 0x10f   :  { %1402 = vmatpush3.bf16.xpose.msra.mxu1 %v1401_v5 }
 0x115   :  { %1354 = vmatpush1.bf16.xpose.msra.mxu0 %v1353_v6  ;;  %v1403_v6 = vpack.c.bf16 %v326_v63, %v325_v62  ;;  %v1425_v62 = vpack.c.bf16 %v320_v61, %v319_v60 }
 0x116   :  { %1356 = vmatprep.subr.bf16.mxu0 %v1355_v7  ;;  %v1381_v7 = vpack.c.bf16 %v207_v2, %v191_v1 }
 0x117   :  { %1404 = vmatprep.subr.bf16.mxu1 %v1403_v6  ;;  %v983_v6 = vld [vmem:[%s1676_s4] sm:$0x3]  ;;  %s1492_s4 = scalar_lea.vmem %s1096_s25, 32 }
 0x118   :  { %1406 = vmatpush3.bf16.xpose.msra.mxu1 %v1405_v16  ;;  %v988_v9 = vrot.slane %v983_v6, %v1599_v50  ;;  %v992_v58 = vrot.slane %v983_v6, %v1585_v44  ;;  %p1493_p2 = scmp.ne.s32.totalorder %s1096_s25, %s1492_s4  ;;  %p1498_p4 = scmp.lt.s32.totalorder %s1492_s4, %s1492_s4 }
 0x11a   :  { %p1499_p5 = por %p1498_p4, %p1497_p3 }
 0x11c   :  { %p1500_p6 = pnand %p1499_p5, %p1493_p2 }
 0x11d   :  { %1358 = vmatpush1.bf16.xpose.msra.mxu0 %v1357_v11  ;;  %v328_v11 = vld [vmem:[#allocation5 + $0xb8] sm:$0xff] }
 0x11e   :  { %1360 = vmatprep.subr.bf16.mxu0 %v1359_v12  ;;  %v223_v12 = vld [vmem:[#allocation2 + $0x570] sm:$0xff] }
 0x125   :  { %1362 = vmatpush1.bf16.xpose.msra.mxu0 %v1361_v17  ;;  %v1407_v17 = vpack.c.bf16 %v328_v11, %v327_v10 }
 0x126   :  { %1364 = vmatprep.subr.bf16.mxu0 %v1363_v18  ;;  %v1385_v18 = vpack.c.bf16 %v239_v13, %v223_v12 }
 0x127   :  { %1408 = vmatprep.subr.bf16.mxu1 %v1407_v17 }
 0x128   :  { %1410 = vmatpush3.bf16.xpose.msra.mxu1 %v1409_v29 }
 0x12c   :  { %907 = vmatmul.mubr.f32.vlgmr.msra.gmra.mrb[0].mxu0 %v393_v23  ;;  %v330_v23 = vld [vmem:[#allocation5 + $0xc8] sm:$0xff] }
 0x12d   :  { %1366 = vmatpush1.bf16.xpose.msra.mxu0 %v1365_v25  ;;  %976 = vmatprep.mubr.f32.mxu0 %v405_v26  ;;  %v255_v25 = vld [vmem:[#allocation2 + $0x670] sm:$0xff]  ;;  %v1411_v31 = vpack.c.bf16 %v330_v23, %v329_v22 }
 0x12e   :  { %1368 = vmatprep.subr.bf16.mxu0 %v1367_v27  ;;  %v271_v26 = vld [vmem:[#allocation2 + $0x6f0] sm:$0xff]  ;;  %v288_v27 = vld [vmem:[#allocation2 + $0x778] sm:$0xff] }
 0x12f   :  { %v1389_v32 = vpack.c.bf16 %v271_v26, %v255_v25  ;;  %1412 = vmatprep.subr.bf16.mxu1 %v1411_v31 }
 0x135   :  { %1370 = vmatpush1.bf16.xpose.msra.mxu0 %v1369_v33  ;;  %v1391_v33 = vpack.c.bf16 %v304_v28, %v288_v27 }
 0x136   :  { %1372 = vmatprep.subr.bf16.mxu0 %v1371_v34  ;;  %v313_v34 = vld [vmem:[#allocation5 + $0x40] sm:$0xff] }
 0x13d   :  { %1374 = vmatpush1.bf16.xpose.msra.mxu0 %v1373_v39  ;;  %v303_v39 = vld [vmem:[#allocation2 + $0x7f0] sm:$0xff] }
 0x13e   :  { %1376 = vmatprep.subr.bf16.mxu0 %v1375_v40  ;;  %v1413_v40 = vpack.c.bf16 %v314_v35, %v313_v34  ;;  %v1393_v41 = vpack.c.bf16 %v303_v39, %v287_v49 }
 0x140   :  { %1414 = vmatpush3.bf16.xpose.msra.mxu1 %v1413_v40 }
 0x141   :  { %1416 = vmatprep.subr.bf16.mxu1 %v1415_v45 }
 0x145   :  { %1378 = vmatpush1.bf16.xpose.msra.mxu0 %v1377_v55  ;;  %v335_v55 = vld [vmem:[#allocation5 + $0xf0] sm:$0xff] }
 0x146   :  { %1380 = vmatprep.subr.bf16.mxu0 %v1379_v59  ;;  %v1423_v59 = vpack.c.bf16 %v336_v56, %v335_v55 }
 0x148   :  { %1418 = vmatpush3.bf16.xpose.msra.mxu1 %v1417_v48 }
 0x149   :  { %1420 = vmatprep.subr.bf16.mxu1 %v1419_v52 }
 0x14d   :  { %1382 = vmatpush1.bf16.xpose.msra.mxu0 %v1381_v7  ;;  %v1525_v7 = vmov 1966171168  }
 0x14e   :  { %1384 = vmatprep.subr.bf16.mxu0 %v1383_v8  ;;  %v1070_v8 = vunpack.c.l.s4 %v1525_v7 }
 0x150   :  { %1422 = vmatpush3.bf16.xpose.msra.mxu1 %v1421_v57  ;;  %v1071_v10 = vunpack.c.0.s8 %v1070_v8 }
 0x151   :  { %1424 = vmatprep.subr.bf16.mxu1 %v1423_v59 }
 0x152   :  { %v1074_v15 = vsub.s32 %v1071_v10, %v1582_v37 }
 0x155   :  { %1386 = vmatpush1.bf16.xpose.msra.mxu0 %v1385_v18 }
 0x156   :  { %1388 = vmatprep.subr.bf16.mxu0 %v1387_v19 }
 0x158   :  { %1426 = vmatpush3.bf16.xpose.msra.mxu1 %v1425_v62 }
 0x15d   :  { %1390 = vmatpush1.bf16.xpose.msra.mxu0 %v1389_v32 }
 0x15e   :  { %1392 = vmatprep.subr.bf16.mxu0 %v1391_v33 }
 0x165   :  { %1394 = vmatpush1.bf16.xpose.msra.mxu0 %v1393_v41 }
 0x16c   :  { %977 = vmatmul.mubr.f32.vlgmr.msra.gmra.mrb[0].mxu0 %v401_v46 }
 0x1be   :  { %v628_v63 = vpop.f32.mrb[0].mxu1 }
 0x1bf   :  { %v630_v1 = vpop.f32.mrb[1].mxu1  ;;  %v1427_v0 = vadd.f32 %v628_v63, %v339_v51 }
 0x23f   :  { %v978_v2 = vpop.f32.mrb[0].mxu0 }
 0x240   :  { %v1428_v3 = vadd.f32 %v1427_v0, %v978_v2  ;;  %v980_v4 = vpop.f32.mrb[1].mxu0 }
 0x242   :  { %v982_v5 = vmax.f32 %v1428_v3, 0.0 }
 0x244   :  { %1137 = vmatprep.mubr.f32.mxu1 %v982_v5 }
 0x245   :  { %1138 = vmatmul.mubr.f32.vlgmr.msra.gmra.mrb[2].mxu1 %v982_v5 }
 0x318   :  { %v1061_v11 = vpop.f32.mrb[2].mxu1 }
 0x319   :  { %v1062_v12 = vadd.f32 %v1061_v11, %v988_v9  ;;  %v1063_v13 = vpop.f32.mrb[3].mxu1 }
 0x31a   :  { %v1064_v14 = vadd.f32 %v1063_v13, %v992_v58 }
 0x31c   :  { %v1068_v16 = vcombine.low %v1062_v12, %v1064_v14 }
 0x31e   :  { %v1075_v17 = vrot.slane %v1068_v16, %v1074_v15 }
 0x320   :  { %v1082_v18 = vrot.slane %v1075_v17, %v1074_v15 }
 0x322   :  { %1088 = vst.msk [vmem:[#allocation7] sm:$0x3] %vm1086_vm0, %v1082_v18 }
 0x323   :  { %1503 = shalt.err (!%p1500_p6)
}
 0x324   :  { %s1504_s28 = scalar_lea.hbm %s1677_s5, 32 }
 0x325   :  { %p1505_p7 = scmp.ne.s32.totalorder %s1677_s5, %s1504_s28  ;;  %p1508_p8 = scmp.lt.u32.totalorder %s1504_s28, %s1677_s5 }
 0x327   :  { %p1510_p9 = pnand %p1508_p8, %p1505_p7 }
 0x329   :  { %1513 = shalt.err (!%p1510_p9)
}
 0x32a   :  { %1098 = dma.vmem_to_hbm [thread:$0]  %s1096_s25, 32, %s1677_s5, [#allocation4]  }
 0x32b   :  { %1518 = dma.done.wait [#allocation4], 32  }
 0x32c   :  { %1519 = vsyncadd [#allocation4], 4294967264 }
 0x32d   :  { %1102 = vsyncpa [#allocation3], 1 }
 0x32e   :  { %1103 = vsyncpa [#allocation6], 1 }
 0x32f   :  { %1104 = vsyncpa [#allocation4], 1 }

</bundles_post_ra>
